<compile_context>
chip_gen: v7x
topology: tpu7x:2x2x1
jax: 0.10.0
libtpu: 0.0.40
codegen_flags: <defaults>
</compile_context>

<pallas_src>
import functools
import numpy as np
import jax
import jax.numpy as jnp
from jax.experimental import pallas as pl
from jax.experimental.pallas import tpu as pltpu


def _channel_attention_kernel(x_ref, w1t_ref, b1_ref, w2t_ref, b2_ref, o_ref,
                              sum_ref, max_ref, *, inv_hw, hw_total, hw_tile,
                              needs_mask):
    """Grid = (N, num_hw_tiles); hw (reduction) axis is last / 'arbitrary'.

    x_ref  : (1, C, hw_tile)  one spatial tile of one batch element (lane-dense)
    w1t_ref: (C, mid)         first Linear weight, pre-transposed
    b1_ref : (1, mid)
    w2t_ref: (mid, C)         second Linear weight, pre-transposed
    b2_ref : (1, C)
    o_ref  : (1, 1, C)        sigmoid(mlp(avg) + mlp(max)), lane-dense row
    sum_ref, max_ref : (C, 1) f32 VMEM accumulators (persist across hw tiles)
    """
    t = pl.program_id(1)
    nt = pl.num_programs(1)

    xf = x_ref[0].astype(jnp.float32)                     # (C, hw_tile)
    if needs_mask:
        lane = jax.lax.broadcasted_iota(jnp.int32, xf.shape, 1)
        valid = (t * hw_tile + lane) < hw_total
        xs = jnp.where(valid, xf, 0.0)
        xm = jnp.where(valid, xf, -jnp.inf)
    else:
        xs = xf
        xm = xf

    part_sum = jnp.sum(xs, axis=-1, keepdims=True)        # (C, 1)
    part_max = jnp.max(xm, axis=-1, keepdims=True)        # (C, 1)

    @pl.when(t == 0)
    def _():
        sum_ref[...] = part_sum
        max_ref[...] = part_max

    @pl.when(t > 0)
    def _():
        sum_ref[...] = sum_ref[...] + part_sum
        max_ref[...] = jnp.maximum(max_ref[...], part_max)

    @pl.when(t == nt - 1)
    def _():
        # (C, 2): column 0 = avg pooled, column 1 = max pooled.
        pooled_cols = jnp.concatenate(
            [sum_ref[...] * inv_hw, max_ref[...]], axis=1)
        pooled = jnp.transpose(pooled_cols)               # (2, C) tiny relayout

        w1t = w1t_ref[...].astype(jnp.float32)            # (C, mid)
        b1r = b1_ref[...].astype(jnp.float32)             # (1, mid)
        w2t = w2t_ref[...].astype(jnp.float32)            # (mid, C)
        b2r = b2_ref[...].astype(jnp.float32)             # (1, C)

        # Both pooled vectors go through the shared MLP in one pass.
        h = jnp.dot(pooled, w1t, preferred_element_type=jnp.float32) + b1r
        h = jnp.maximum(h, 0.0)                           # (2, mid)
        o = jnp.dot(h, w2t, preferred_element_type=jnp.float32) + b2r  # (2, C)

        y = jax.nn.sigmoid(o[0:1, :] + o[1:2, :])         # (1, C) lane-dense
        o_ref[...] = y.reshape(o_ref.shape).astype(o_ref.dtype)


def _choose_hw_tile(hw, c, itemsize, cap_bytes):
    """Tile the HW axis: either the full extent (if it fits the byte cap) or
    the largest multiple of 128 under the cap (last tile masked in-kernel)."""
    row_bytes = max(1, c * itemsize)
    max_elems = max(128, (cap_bytes // row_bytes) // 128 * 128)
    if hw <= max_elems:
        return hw                      # single full tile (any HW, incl. odd)
    return max_elems                   # multiple of 128; partial tail masked


def channel_attention(x, w1, b1, w2, b2, *, tile_cap_bytes=6 << 20):
    """sigmoid(MLP(avgpool(x)) + MLP(maxpool(x))) -> (N, C, 1, 1)."""
    N, C, H, W = x.shape
    mid = w1.shape[0]
    assert w1.shape == (mid, C) and w2.shape == (C, mid)
    assert b1.shape == (mid,) and b2.shape == (C,)

    HW = H * W
    x2 = x.reshape(N, C, HW)                 # contiguous, free reshape
    w1t = jnp.transpose(w1)                  # (C, mid)  tiny, done in XLA
    w2t = jnp.transpose(w2)                  # (mid, C)
    b1r = b1.reshape(1, mid)
    b2r = b2.reshape(1, C)

    hw_tile = _choose_hw_tile(HW, C, x.dtype.itemsize, tile_cap_bytes)
    nt = pl.cdiv(HW, hw_tile)
    needs_mask = (HW % hw_tile) != 0

    kernel = functools.partial(
        _channel_attention_kernel,
        inv_hw=1.0 / float(HW),
        hw_total=HW,
        hw_tile=hw_tile,
        needs_mask=needs_mask,
    )

    w_bytes = (w1.size + w2.size + b1.size + b2.size) * w1.dtype.itemsize
    cost = pl.CostEstimate(
        flops=2 * N * C * HW + 8 * N * C * mid,
        transcendentals=N * C,
        bytes_accessed=x.size * x.dtype.itemsize + w_bytes + N * C * x.dtype.itemsize,
    )

    # VMEM budget: double-buffered input tile + worst-case f32 temporaries in
    # the masked reduce + (double-buffered) weights + slack.  Kept under 48 MiB
    # so it is safe even on v7x's 64 MiB physical VMEM.
    tile_bytes = C * hw_tile * x.dtype.itemsize
    temp_bytes = 2 * C * hw_tile * 4
    vmem_limit = 2 * tile_bytes + temp_bytes + 2 * w_bytes + (2 << 20)
    vmem_limit = int(min(max(vmem_limit, 16 << 20), 48 << 20))

    out = pl.pallas_call(
        kernel,
        out_shape=jax.ShapeDtypeStruct((N, 1, C), x.dtype),
        grid=(N, nt),
        in_specs=[
            pl.BlockSpec((1, C, hw_tile), lambda n, t: (n, 0, t)),
            pl.BlockSpec((C, mid), lambda n, t: (0, 0)),
            pl.BlockSpec((1, mid), lambda n, t: (0, 0)),
            pl.BlockSpec((mid, C), lambda n, t: (0, 0)),
            pl.BlockSpec((1, C), lambda n, t: (0, 0)),
        ],
        out_specs=pl.BlockSpec((1, 1, C), lambda n, t: (n, 0, 0)),
        scratch_shapes=[
            pltpu.VMEM((C, 1), jnp.float32),     # running sum
            pltpu.VMEM((C, 1), jnp.float32),     # running max
        ],
        compiler_params=pltpu.CompilerParams(
            dimension_semantics=("parallel", "arbitrary"),
            vmem_limit_bytes=vmem_limit,
        ),
        cost_estimate=cost,
    )(x2, w1t, b1r, w2t, b2r)

    return out.reshape(N, C, 1, 1)


def channel_attention_ref(x, w1, b1, w2, b2):
    """Pure-JAX reference mirroring the PyTorch forward."""
    xf = x.astype(jnp.float32)
    avg = xf.mean(axis=(2, 3))                           # (N, C)
    mx = xf.max(axis=(2, 3))                             # (N, C)

    def mlp(v):
        h = jnp.maximum(v @ w1.astype(jnp.float32).T + b1.astype(jnp.float32), 0.0)
        return h @ w2.astype(jnp.float32).T + b2.astype(jnp.float32)

    y = jax.nn.sigmoid(mlp(avg) + mlp(mx))
    N, C = y.shape
    return y.reshape(N, C, 1, 1).astype(x.dtype)


if __name__ == "__main__":
    key = jax.random.PRNGKey(0)
    k1, k2, k3, k4, k5, k6 = jax.random.split(key, 6)

    N, C, H, W = 2, 64, 16, 16
    reduction = 16
    mid = C // reduction                                 # 4

    x = jax.random.normal(k1, (N, C, H, W), dtype=jnp.float32)
    w1 = jax.random.normal(k2, (mid, C), dtype=jnp.float32) * 0.1
    b1 = jax.random.normal(k3, (mid,), dtype=jnp.float32) * 0.1
    w2 = jax.random.normal(k4, (C, mid), dtype=jnp.float32) * 0.1
    b2 = jax.random.normal(k5, (C,), dtype=jnp.float32) * 0.1

    # Main path: single full-HW tile per batch element.
    y = channel_attention(x, w1, b1, w2, b2)
    y = jax.block_until_ready(y)
    y_ref = channel_attention_ref(x, w1, b1, w2, b2)
    assert y.shape == (N, C, 1, 1), y.shape
    np.testing.assert_allclose(np.asarray(y), np.asarray(y_ref),
                               rtol=1e-5, atol=1e-5)

    # Masked multi-tile path: HW = 13*13 = 169 with a forced 128-wide tile
    # (exercises accumulation across tiles + the partial-tile lane mask).
    H2 = W2 = 13
    x_odd = jax.random.normal(k6, (N, C, H2, W2), dtype=jnp.float32)
    y_odd = channel_attention(x_odd, w1, b1, w2, b2,
                              tile_cap_bytes=128 * C * x_odd.dtype.itemsize)
    y_odd = jax.block_until_ready(y_odd)
    y_odd_ref = channel_attention_ref(x_odd, w1, b1, w2, b2)
    np.testing.assert_allclose(np.asarray(y_odd), np.asarray(y_odd_ref),
                               rtol=1e-5, atol=1e-5)

    print("KERNEL_OK")
</pallas_src>

<mosaic_0001>
module attributes {stable_mosaic.version = 11 : i64} {
  func.func @_channel_attention_kernel(%arg0: i32, %arg1: i32, %arg2: memref<1x64x256xf32, #tpu.memory_space<vmem>>, %arg3: memref<64x4xf32, #tpu.memory_space<vmem>>, %arg4: memref<1x4xf32, #tpu.memory_space<vmem>>, %arg5: memref<4x64xf32, #tpu.memory_space<vmem>>, %arg6: memref<1x64xf32, #tpu.memory_space<vmem>>, %arg7: memref<1x1x64xf32, #tpu.memory_space<vmem>>, %arg8: memref<64x1xf32, #tpu.memory_space<vmem>>, %arg9: memref<64x1xf32, #tpu.memory_space<vmem>>) attributes {dimension_semantics = [#tpu.dimension_semantics<parallel>, #tpu.dimension_semantics<arbitrary>], iteration_bounds = array<i64: 2, 1>, scalar_prefetch = 0 : i64, scratch_operands = 2 : i64, tpu.core_type = #tpu.core_type<tc>, window_params = [{transform_indices = @transform_0, window_bounds = array<i64: 1, 64, 256>}, {pipeline_mode = #tpu.pipeline_mode<synchronous>, transform_indices = @transform_1, window_bounds = array<i64: 64, 4>}, {pipeline_mode = #tpu.pipeline_mode<synchronous>, transform_indices = @transform_2, window_bounds = array<i64: 1, 4>}, {pipeline_mode = #tpu.pipeline_mode<synchronous>, transform_indices = @transform_3, window_bounds = array<i64: 4, 64>}, {pipeline_mode = #tpu.pipeline_mode<synchronous>, transform_indices = @transform_4, window_bounds = array<i64: 1, 64>}, {transform_indices = @transform_5, window_bounds = array<i64: 1, 1, 64>}]} {
    %c0 = arith.constant 0 : index
    %c0_0 = arith.constant 0 : index
    %c0_1 = arith.constant 0 : index
    %0 = vector.load %arg2[%c0, %c0_0, %c0_1] : memref<1x64x256xf32, #tpu.memory_space<vmem>>, vector<1x64x256xf32>
    %1 = vector.shape_cast %0 : vector<1x64x256xf32> to vector<64x256xf32>
    %cst = arith.constant dense<0.000000e+00> : vector<64xf32>
    %2 = vector.multi_reduction <add>, %1, %cst [1] : vector<64x256xf32> to vector<64xf32>
    %3 = vector.shape_cast %2 : vector<64xf32> to vector<64x1xf32>
    %cst_2 = arith.constant dense<0xFF800000> : vector<64xf32>
    %4 = vector.multi_reduction <maximumf>, %1, %cst_2 [1] : vector<64x256xf32> to vector<64xf32>
    %5 = vector.shape_cast %4 : vector<64xf32> to vector<64x1xf32>
    %c0_i32 = arith.constant 0 : i32
    %6 = arith.cmpi eq, %arg1, %c0_i32 : i32
    %7 = arith.extui %6 : i1 to i32
    %c0_i32_3 = arith.constant 0 : i32
    %8 = arith.cmpi ne, %7, %c0_i32_3 : i32
    scf.if %8 {
      %c0_8 = arith.constant 0 : index
      %c0_9 = arith.constant 0 : index
      %15 = vector.load %arg8[%c0_8, %c0_9] : memref<64x1xf32, #tpu.memory_space<vmem>>, vector<64x1xf32>
      tpu.vector_store %arg8[%c0_8, %c0_9], %3 {strides = array<i32>} : memref<64x1xf32, #tpu.memory_space<vmem>>, vector<64x1xf32>,
      %c0_10 = arith.constant 0 : index
      %c0_11 = arith.constant 0 : index
      %16 = vector.load %arg9[%c0_10, %c0_11] : memref<64x1xf32, #tpu.memory_space<vmem>>, vector<64x1xf32>
      tpu.vector_store %arg9[%c0_10, %c0_11], %5 {strides = array<i32>} : memref<64x1xf32, #tpu.memory_space<vmem>>, vector<64x1xf32>,
    } else {
    }
    %c0_i32_4 = arith.constant 0 : i32
    %9 = arith.cmpi sgt, %arg1, %c0_i32_4 : i32
    %10 = arith.extui %9 : i1 to i32
    %c0_i32_5 = arith.constant 0 : i32
    %11 = arith.cmpi ne, %10, %c0_i32_5 : i32
    scf.if %11 {
      %c0_8 = arith.constant 0 : index
      %c0_9 = arith.constant 0 : index
      %15 = vector.load %arg8[%c0_8, %c0_9] : memref<64x1xf32, #tpu.memory_space<vmem>>, vector<64x1xf32>
      %16 = arith.addf %15, %3 : vector<64x1xf32>
      %c0_10 = arith.constant 0 : index
      %c0_11 = arith.constant 0 : index
      %17 = vector.load %arg8[%c0_10, %c0_11] : memref<64x1xf32, #tpu.memory_space<vmem>>, vector<64x1xf32>
      tpu.vector_store %arg8[%c0_10, %c0_11], %16 {strides = array<i32>} : memref<64x1xf32, #tpu.memory_space<vmem>>, vector<64x1xf32>,
      %c0_12 = arith.constant 0 : index
      %c0_13 = arith.constant 0 : index
      %18 = vector.load %arg9[%c0_12, %c0_13] : memref<64x1xf32, #tpu.memory_space<vmem>>, vector<64x1xf32>
      %19 = arith.maximumf %18, %5 : vector<64x1xf32>
      %c0_14 = arith.constant 0 : index
      %c0_15 = arith.constant 0 : index
      %20 = vector.load %arg9[%c0_14, %c0_15] : memref<64x1xf32, #tpu.memory_space<vmem>>, vector<64x1xf32>
      tpu.vector_store %arg9[%c0_14, %c0_15], %19 {strides = array<i32>} : memref<64x1xf32, #tpu.memory_space<vmem>>, vector<64x1xf32>,
    } else {
    }
    %c0_i32_6 = arith.constant 0 : i32
    %12 = arith.cmpi eq, %arg1, %c0_i32_6 : i32
    %13 = arith.extui %12 : i1 to i32
    %c0_i32_7 = arith.constant 0 : i32
    %14 = arith.cmpi ne, %13, %c0_i32_7 : i32
    scf.if %14 {
      %c0_8 = arith.constant 0 : index
      %c0_9 = arith.constant 0 : index
      %15 = vector.load %arg8[%c0_8, %c0_9] : memref<64x1xf32, #tpu.memory_space<vmem>>, vector<64x1xf32>
      %cst_10 = arith.constant 3.906250e-03 : f32
      %16 = vector.broadcast %cst_10 : f32 to vector<64x1xf32>
      %17 = arith.mulf %15, %16 : vector<64x1xf32>
      %c0_11 = arith.constant 0 : index
      %c0_12 = arith.constant 0 : index
      %18 = vector.load %arg9[%c0_11, %c0_12] : memref<64x1xf32, #tpu.memory_space<vmem>>, vector<64x1xf32>
      %19 = tpu.concatenate %17, %18 in 1 : vector<64x1xf32>, vector<64x1xf32> -> vector<64x2xf32>
      %20 = tpu.transpose %19, [1, 0] : vector<64x2xf32> -> vector<2x64xf32>
      %c0_13 = arith.constant 0 : index
      %c0_14 = arith.constant 0 : index
      %21 = vector.load %arg3[%c0_13, %c0_14] : memref<64x4xf32, #tpu.memory_space<vmem>>, vector<64x4xf32>
      %c0_15 = arith.constant 0 : index
      %c0_16 = arith.constant 0 : index
      %22 = vector.load %arg4[%c0_15, %c0_16] : memref<1x4xf32, #tpu.memory_space<vmem>>, vector<1x4xf32>
      %c0_17 = arith.constant 0 : index
      %c0_18 = arith.constant 0 : index
      %23 = vector.load %arg5[%c0_17, %c0_18] : memref<4x64xf32, #tpu.memory_space<vmem>>, vector<4x64xf32>
      %c0_19 = arith.constant 0 : index
      %c0_20 = arith.constant 0 : index
      %24 = vector.load %arg6[%c0_19, %c0_20] : memref<1x64xf32, #tpu.memory_space<vmem>>, vector<1x64xf32>
      %cst_21 = arith.constant dense<0.000000e+00> : vector<2x4xf32>
      %25 = tpu.matmul %20, %21, %cst_21 {dimension_numbers = #tpu.dot_dimension_numbers<[1], [0], [0], [1], [0, 0, 1, 1], [], []>} : vector<2x64xf32>, vector<64x4xf32>, vector<2x4xf32> -> vector<2x4xf32>
      %26 = vector.broadcast %22 : vector<1x4xf32> to vector<2x4xf32>
      %27 = arith.addf %25, %26 : vector<2x4xf32>
      %cst_22 = arith.constant 0.000000e+00 : f32
      %28 = vector.broadcast %cst_22 : f32 to vector<2x4xf32>
      %29 = arith.maximumf %27, %28 : vector<2x4xf32>
      %cst_23 = arith.constant dense<0.000000e+00> : vector<2x64xf32>
      %30 = tpu.matmul %29, %23, %cst_23 {dimension_numbers = #tpu.dot_dimension_numbers<[1], [0], [0], [1], [0, 0, 1, 1], [], []>} : vector<2x4xf32>, vector<4x64xf32>, vector<2x64xf32> -> vector<2x64xf32>
      %31 = vector.broadcast %24 : vector<1x64xf32> to vector<2x64xf32>
      %32 = arith.addf %30, %31 : vector<2x64xf32>
      %33 = vector.extract_strided_slice %32 {offsets = [0, 0], sizes = [1, 64], strides = [1, 1]} : vector<2x64xf32> to vector<1x64xf32>
      %34 = vector.extract_strided_slice %32 {offsets = [1, 0], sizes = [1, 64], strides = [1, 1]} : vector<2x64xf32> to vector<1x64xf32>
      %35 = arith.addf %33, %34 : vector<1x64xf32>
      %36 = arith.negf %35 : vector<1x64xf32>
      %37 = math.exp %36 : vector<1x64xf32>
      %cst_24 = arith.constant 1.000000e+00 : f32
      %38 = vector.broadcast %cst_24 : f32 to vector<1x64xf32>
      %39 = arith.addf %38, %37 : vector<1x64xf32>
      %40 = arith.divf %38, %39 : vector<1x64xf32>
      %41 = vector.shape_cast %40 : vector<1x64xf32> to vector<1x1x64xf32>
      %c0_25 = arith.constant 0 : index
      %c0_26 = arith.constant 0 : index
      %c0_27 = arith.constant 0 : index
      %42 = vector.load %arg7[%c0_25, %c0_26, %c0_27] : memref<1x1x64xf32, #tpu.memory_space<vmem>>, vector<1x1x64xf32>
      tpu.vector_store %arg7[%c0_25, %c0_26, %c0_27], %41 {strides = array<i32>} : memref<1x1x64xf32, #tpu.memory_space<vmem>>, vector<1x1x64xf32>,
    } else {
    }
    return
  }
  func.func @transform_0(%arg0: i32, %arg1: i32) -> (i32, i32, i32) {
    %c0_i32 = arith.constant 0 : i32
    %c0_i32_0 = arith.constant 0 : i32
    return %arg0, %c0_i32, %arg1 : i32, i32, i32
  }
  func.func @transform_1(%arg0: i32, %arg1: i32) -> (i32, i32) {
    %c0_i32 = arith.constant 0 : i32
    %c0_i32_0 = arith.constant 0 : i32
    %c0_i32_1 = arith.constant 0 : i32
    return %c0_i32, %c0_i32_0 : i32, i32
  }
  func.func @transform_2(%arg0: i32, %arg1: i32) -> (i32, i32) {
    %c0_i32 = arith.constant 0 : i32
    %c0_i32_0 = arith.constant 0 : i32
    %c0_i32_1 = arith.constant 0 : i32
    return %c0_i32, %c0_i32_0 : i32, i32
  }
  func.func @transform_3(%arg0: i32, %arg1: i32) -> (i32, i32) {
    %c0_i32 = arith.constant 0 : i32
    %c0_i32_0 = arith.constant 0 : i32
    %c0_i32_1 = arith.constant 0 : i32
    return %c0_i32, %c0_i32_0 : i32, i32
  }
  func.func @transform_4(%arg0: i32, %arg1: i32) -> (i32, i32) {
    %c0_i32 = arith.constant 0 : i32
    %c0_i32_0 = arith.constant 0 : i32
    %c0_i32_1 = arith.constant 0 : i32
    return %c0_i32, %c0_i32_0 : i32, i32
  }
  func.func @transform_5(%arg0: i32, %arg1: i32) -> (i32, i32, i32) {
    %c0_i32 = arith.constant 0 : i32
    %c0_i32_0 = arith.constant 0 : i32
    %c0_i32_1 = arith.constant 0 : i32
    return %arg0, %c0_i32, %c0_i32_0 : i32, i32, i32
  }
}

</mosaic_0001>

<bundles_post_ra>
// kernel: tpu_custom_call.1
= control target key start
LH: loop header
LB: loop body
LE: loop exit
PB: predicated region body
PF: predicated region fallthrough
CT: control target
= control target key end

     0   :  { %10 = vsyncpa [#allocation5], 0  ;;  %s1304_s0 = inlined_call_operand.hbm [shape: f32[2,64,256], index: 0, kind: input, shape index: {}]   ;;  %s1305_s1 = inlined_call_operand.vmem [shape: f32[64,4], index: 1, kind: input, shape index: {}]   ;;  %s1306_s2 = inlined_call_operand.vmem [shape: f32[1,4], index: 2, kind: input, shape index: {}]   ;;  %s1307_s3 = inlined_call_operand.vmem [shape: f32[4,64], index: 3, kind: input, shape index: {}]   ;;  %s1308_s4 = inlined_call_operand.vmem [shape: f32[1,64], index: 4, kind: input, shape index: {}]   ;;  %s1309_s5 = inlined_call_operand.hbm [shape: f32[2,1,64], index: 5, kind: output, shape index: {}]  }
   0x1   :  { %12 = vsyncpa [#allocation5 + $0x1], 0 }
   0x2   :  { %13 = vsyncpa [#allocation6], 0 }
   0x3   :  { %15 = vsyncpa [#allocation6 + $0x1], 0  ;;  %s1065_s18 = smov 0   ;;  %s1067_s19 = smov 0  }
   0x4   :  { %s1069_s20 = smov 0   ;;  %s1071_s21 = smov 0  }
   0x5   :  { %s1073_s22 = smov 0   ;;  %s1075_s23 = smov 0  }
   0x6 LB: > { %s775_s24 = sadd.s32 4294967295, %s1025_s23   ;;  %s776_s25 = sadd.s32 4294967294, %s1025_s23   ;;  %s1025_s23 = sphi %s1075_s23, %s21_s23   ;;  %s1021_s22 = sphi %s1073_s22, %s1324_s22   ;;  %s1017_s21 = sphi %s1071_s21, %s1323_s21   ;;  %s1013_s20 = sphi %s1069_s20, %s1322_s20   ;;  %s1009_s19 = sphi %s1067_s19, %s1321_s19   ;;  %s1005_s18 = sphi %s1065_s18, %s1320_s18  }
   0x7   : > { %s33_s26 = sadd.s32 1, %s1021_s22  ;;  %s42_s27 = sadd.s32 1, %s1013_s20 }
   0x8   : > { %p35_p0 = scmp.ge.s32.totalorder %s33_s26, 2  ;;  %p49_p1 = scmp.ne.s32.totalorder %s1013_s20, %s1009_s19 }
   0x9   : > { %p50_p2 = scmp.eq.s32.totalorder %s1025_s23, 0  ;;  %p55_p3 = scmp.ne.s32.totalorder %s1009_s19, %s1005_s18 }
   0xa   : > { %s1326_s26 = smov (%p35_p0, %s33_s26), 0  ;;  %p56_p5 = scmp.eq.s32.totalorder %s775_s24, 0 }
   0xb   : > { %p1106_p4 = por %p50_p2, %p49_p1  ;;  %s37_s29 = ssub.s32 %s1021_s22, %s1326_s26 }
   0xc   : > { %p163_p6 = scmp.eq.s32.totalorder %s775_s24, 1  ;;  %p40_p7 = scmp.eq.s32.totalorder %s37_s29, 0 }
   0xd   : > { %p1112_p8 = por %p56_p5, %p55_p3  ;;  %p169_p10 = scmp.eq.s32.totalorder %s776_s25, 1 }
   0xe   : > { %p1116_p9 = por %p163_p6, %p49_p1  ;;  %p853_p13 = scmp.lt.s32.totalorder %s1025_s23, 2 }
   0xf   : > { %s1121_s7 = scalar_select %p40_p7, %s1013_s20, %s42_s27  }
  0x10   : > { %s1313_s6 = scalar_select %p1116_p9, 1, 0 }
  0x11   : > { %p1123_p11 = por %p169_p10, %p55_p3  ;;  %s201_s9 = sand.u32 1, %s1013_s20  }
  0x12   : > { %s779_s10 = sshll.u32 %s201_s9, 7  ;;  %s793_s11 = sshll.u32 %s1021_s22, 11 }
  0x13   : > { %s1314_s8 = scalar_select %p1123_p11, 1, 0 }
  0x14   : > { %s1134_s14 = scalar_lea.hbm %s1304_s0, %s793_s11  ;;  %s205_s15 = scalar_lea.vmem [#allocation4], %s779_s10 }
  0x15   : > { %s214_s16 = sshll.u32 %s205_s15, 4  ;;  %p1140_p0 = pnand %p853_p13, %p1106_p4  ;;  %s1136_s16 = int_to_ptr.vmem [resolvable:$true] %s214_s16 }
  0x16   : > { %s1145_s24 = scalar_lea.sflag [#allocation5], %s201_s9  ;;  %s913_s25 = scalar_lea.hbm %s1134_s14, 2048 }
  0x17   : > { %p914_p2 = scmp.ne.s32.totalorder %s1134_s14, %s913_s25  ;;  %p915_p3 = pneg %p1140_p0 }
  0x18   : > { %s918_s28 = scalar_lea.hbm %s1304_s0, 4096  ;;  %p919_p4 = scmp.lt.u32.totalorder %s1134_s14, %s1304_s0 }
  0x19   : > { %p916_p5 = pnand %p915_p3, %p914_p2  ;;  %p920_p7 = scmp.lt.u32.totalorder %s918_s28, %s913_s25 }
  0x1a   : > { %p922_p13 = scmp.lt.u32.totalorder %s913_s25, %s1134_s14 }
  0x1b   : > { %p917_p6 = pneg %p916_p5  ;;  %p921_p10 = por %p920_p7, %p919_p4 }
  0x1d   : > { %p923_p12 = por %p922_p13, %p921_p10 }
  0x1f   : > { %p924_p1 = pnand %p923_p12, %p917_p6 }
  0x21   : > { %927 = shalt.err (!%p924_p1)
}
  0x22   : > { %s928_s9 = scalar_lea.vmem %s1136_s16, 2048  ;;  %s1027_s12 = smov [#allocation4]  }
  0x23   : > { %p929_p2 = scmp.ne.s32.totalorder %s1136_s16, %s928_s9  ;;  %s933_s13 = sshll.u32 %s1027_s12, 4  ;;  %s934_s13 = int_to_ptr.vmem [resolvable:$false] %s933_s13 }
  0x24   : > { %s935_s15 = scalar_lea.vmem %s934_s13, 4096  ;;  %p936_p9 = scmp.lt.s32.totalorder %s1136_s16, %s934_s13 }
  0x25   : > { %p931_p5 = pnand %p929_p2, %p915_p3  ;;  %p937_p4 = scmp.lt.s32.totalorder %s935_s15, %s928_s9 }
  0x27   : > { %p932_p11 = pneg %p931_p5  ;;  %p938_p7 = por %p937_p4, %p936_p9 }
  0x29   : > { %p939_p10 = pnand %p938_p7, %p932_p11 }
  0x2b   : > { %942 = shalt.err (!%p939_p10)
}
  0x2c   : > { %s1028_s25 = smov 256   ;;  %s1029_s27 = smov 16  }
  0x2d   : > { %848 = dma.hbm_to_vmem [thread:$0]  (!%p1140_p0), %s1134_s14, 2048, %s1136_s16, %s1145_s24, %s1028_s25, %s1028_s25, %s1029_s27  }
  0x2e   : > { %p222_p12 = scmp.lt.s32.totalorder %s1025_s23, 3  ;;  %p1316_p1 = scmp.ge.s32.totalorder %s1025_s23, 1 }
  0x30   : > { %p223_p3 = pnand %p1316_p1, %p222_p12 }
  0x31   : > { %s1177_s29 = sand.u32 (!%p223_p3), 1, %s1009_s19  }
  0x32   : > { %226 = sbr.rel (%p223_p3) target bundleno = 930 (0x3a2), region = 40  ;;  %s783_s28 = sshll.u32 (!%p223_p3), %s1177_s29, 7 }
  0x33   : > { %s229_s10 = scalar_lea.sflag (!%p223_p3), [#allocation5], %s1177_s29  ;;  %s232_s11 = scalar_lea.vmem (!%p223_p3), [#allocation4], %s783_s28 }
  0x39   : > { %996 = dma.done.wait (%p1112_p8), %s229_s10, 2048  }
  0x3a   : > { %998 = vsyncadd (%p1112_p8), %s229_s10, 4294965248  ;;  %v259_v0 = vld [vmem:[%s232_s11] sm:$0xff]  ;;  %v260_v1 = vld [vmem:[%s232_s11 + $0x8] sm:$0xff]  ;;  %vm327_vm0 = vcmask 7168   ;;  %s1030_s30 = smov 1   ;;  %v1031_v56 = vmov 0.0|0.0  }
  0x3b   : > { %v261_v2 = vld [vmem:[%s232_s11 + $0x10] sm:$0xff]  ;;  %v299_v3 = vmax.f32 %v259_v0, %v260_v1  ;;  %v262_v4 = vld [vmem:[%s232_s11 + $0x18] sm:$0xff]  ;;  %v263_v5 = vld [vmem:[%s232_s11 + $0x20] sm:$0xff]  ;;  %v275_v24 = vadd.f32 %v260_v1, %v259_v0  ;;  %829 = vmatprep.subr.bf16.mxu0 %v1031_v56  ;;  %v1032_v60 = vmov 0.0   ;;  %vm1033_vm1 = vmmov 0   ;;  %s790_s25 = sshll.u32 %s1017_s21, 4 }
  0x3c   : > { %v264_v6 = vld [vmem:[%s232_s11 + $0x28] sm:$0xff]  ;;  %v265_v8 = vld [vmem:[%s232_s11 + $0x30] sm:$0xff]  ;;  %v302_v9 = vmax.f32 %v261_v2, %v262_v4  ;;  %v266_v10 = vld [vmem:[%s232_s11 + $0x38] sm:$0xff]  ;;  %v278_v25 = vadd.f32 %v262_v4, %v261_v2  ;;  %824 = vmatprep.subr.mxu1 %v1032_v60  ;;  %821 = vmatprep.mubr.msk.f32.mxu0 %vm1033_vm1, %v1032_v60  ;;  %vm514_vm2 = vcmask 523264   ;;  %vm599_vm3 = vcmask 1043456   ;;  %s257_s27 = scalar_lea.vmem [#allocation7], %s1177_s29  ;;  %s1255_s14 = scalar_lea.hbm %s1309_s5, %s790_s25 }
  0x3d   : > { %v305_v7 = vmax.f32 %v263_v5, %v264_v6  ;;  %300 = vmax.xlane.f32.xlu0 %v299_v3  ;;  %v267_v11 = vld [vmem:[%s232_s11 + $0x40] sm:$0xff]  ;;  %v268_v12 = vld [vmem:[%s232_s11 + $0x48] sm:$0xff]  ;;  %v308_v13 = vmax.f32 %v265_v8, %v266_v10  ;;  %v269_v14 = vld [vmem:[%s232_s11 + $0x50] sm:$0xff]  ;;  %v281_v26 = vadd.f32 %v264_v6, %v263_v5  ;;  %v284_v27 = vadd.f32 %v266_v10, %v265_v8  ;;  %s698_s28 = sshll.u32 %s257_s27, 4  ;;  %p1317_p9 = scmp.ne.s32.totalorder %s1313_s6, 0  ;;  %s1257_s28 = int_to_ptr.vmem [resolvable:$true] %s698_s28 }
  0x3e   : > { %v270_v15 = vld [vmem:[%s232_s11 + $0x58] sm:$0xff]  ;;  %v311_v16 = vmax.f32 %v267_v11, %v268_v12  ;;  %v271_v17 = vld [vmem:[%s232_s11 + $0x60] sm:$0xff]  ;;  %v272_v18 = vld [vmem:[%s232_s11 + $0x68] sm:$0xff]  ;;  %v287_v28 = vadd.f32 %v268_v12, %v267_v11  ;;  %826 = vmatprep.mubr.msk.f32.mxu1 %vm1033_vm1, %v1032_v60  ;;  %vm595_vm4 = vcmask 31744   ;;  %vm683_vm5 = vcmask 516096   ;;  %s943_s16 = scalar_lea.vmem %s1257_s28, 16 }
  0x3f   : > { %306 = vmax.xlane.f32.xlu1 %v305_v7  ;;  %v314_v19 = vmax.f32 %v269_v14, %v270_v15  ;;  %v273_v20 = vld [vmem:[%s232_s11 + $0x70] sm:$0xff]  ;;  %v274_v21 = vld [vmem:[%s232_s11 + $0x78] sm:$0xff]  ;;  %v317_v22 = vmax.f32 %v271_v17, %v272_v18  ;;  %v290_v29 = vadd.f32 %v270_v15, %v269_v14  ;;  %v293_v30 = vadd.f32 %v272_v18, %v271_v17  ;;  %v497_v53 = vld [vmem:[%s1305_s1] sm:$0xff]  ;;  %p944_p8 = scmp.ne.s32.totalorder %s1257_s28, %s943_s16  ;;  %s1034_s21 = smov [#allocation7]  }
  0x40   : > { %v320_v23 = vmax.f32 %v273_v20, %v274_v21  ;;  %v296_v31 = vadd.f32 %v274_v21, %v273_v20  ;;  %v498_v54 = vld [vmem:[%s1305_s1 + $0x8] sm:$0xff]  ;;  %v499_v58 = vld [vmem:[%s1305_s1 + $0x10] sm:$0xff]  ;;  %v500_v59 = vld [vmem:[%s1305_s1 + $0x18] sm:$0xff]  ;;  %s947_s17 = sshll.u32 %s1034_s21, 4  ;;  %s948_s17 = int_to_ptr.vmem [resolvable:$false] %s947_s17 }
  0x41   : > { %303 = vmax.xlane.f32.xlu0 %v302_v9  ;;  %v830_v57 = vpack.c.bf16 %v498_v54, %v497_v53  ;;  %v833_v62 = vpack.c.bf16 %v500_v59, %v499_v58  ;;  %v501_v0 = vld [vmem:[%s1305_s1 + $0x20] sm:$0xff]  ;;  %v502_v1 = vld [vmem:[%s1305_s1 + $0x28] sm:$0xff]  ;;  %v503_v3 = vld [vmem:[%s1305_s1 + $0x30] sm:$0xff]  ;;  %p945_p11 = pnand %p944_p8, %p1317_p9  ;;  %s949_s24 = scalar_lea.vmem %s948_s17, 32 }
  0x42   : > { %v836_v2 = vpack.c.bf16 %v502_v1, %v501_v0  ;;  %v504_v4 = vld [vmem:[%s1305_s1 + $0x38] sm:$0xff]  ;;  %p950_p6 = scmp.lt.s32.totalorder %s1257_s28, %s948_s17  ;;  %p951_p13 = scmp.lt.s32.totalorder %s949_s24, %s943_s16 }
  0x43   : > { %309 = vmax.xlane.f32.xlu1 %v308_v13  ;;  %831 = vmatpush3.bf16.msra.mxu0 %v830_v57  ;;  %v839_v5 = vpack.c.bf16 %v504_v4, %v503_v3  ;;  %p946_p0 = pneg %p945_p11 }
  0x44   : > { %832 = vmatprep.subr.bf16.mxu0 %v1031_v56  ;;  %p952_p2 = por %p951_p13, %p950_p6 }
  0x45   : > { %312 = vmax.xlane.f32.xlu0 %v311_v16 }
  0x46   : > { %p953_p5 = pnand %p952_p2, %p946_p0 }
  0x47   : > { %315 = vmax.xlane.f32.xlu1 %v314_v19  ;;  %834 = vmatpush3.bf16.msra.mxu0 %v833_v62 }
  0x48   : > { %835 = vmatprep.subr.bf16.mxu0 %v1031_v56 }
  0x49   : > { %318 = vmax.xlane.f32.xlu0 %v317_v22 }
  0x4b   : > { %321 = vmax.xlane.f32.xlu1 %v320_v23  ;;  %837 = vmatpush3.bf16.msra.mxu0 %v836_v2 }
  0x4c   : > { %838 = vmatprep.subr.bf16.mxu0 %v1031_v56 }
  0x4d   : > { %276 = vadd.xlane.f32.xlu0 %v275_v24 }
  0x4f   : > { %279 = vadd.xlane.f32.xlu1 %v278_v25  ;;  %840 = vmatpush3.bf16.msra.mxu0 %v839_v5 }
  0x51   : > { %282 = vadd.xlane.f32.xlu0 %v281_v26 }
  0x53   : > { %285 = vadd.xlane.f32.xlu1 %v284_v27 }
  0x55   : > { %288 = vadd.xlane.f32.xlu0 %v287_v28 }
  0x57   : > { %291 = vadd.xlane.f32.xlu1 %v290_v29 }
  0x59   : > { %294 = vadd.xlane.f32.xlu0 %v293_v30 }
  0x5b   : > { %297 = vadd.xlane.f32.xlu1 %v296_v31 }
  0xca   : > { %v301_v32 = vpop.xlane.xlu0 %300 }
  0xcb   : > { %336 = vst.msk [vmem:[#allocation3] sm:$0xff] %vm327_vm0, %v301_v32 }
  0xcc   : > { %v307_v33 = vpop.xlane.xlu1 %306 }
  0xcd   : > { %338 = vst.msk [vmem:[#allocation3 + $0x10] sm:$0xff] %vm327_vm0, %v307_v33 }
  0xce   : > { %v304_v34 = vpop.xlane.xlu0 %303 }
  0xcf   : > { %337 = vst.msk [vmem:[#allocation3 + $0x8] sm:$0xff] %vm327_vm0, %v304_v34 }
  0xd0   : > { %v310_v35 = vpop.xlane.xlu1 %309 }
  0xd1   : > { %339 = vst.msk [vmem:[#allocation3 + $0x18] sm:$0xff] %vm327_vm0, %v310_v35 }
  0xd2   : > { %v313_v36 = vpop.xlane.xlu0 %312  ;;  %v416_v37 = vld [vmem:[#allocation3] sm:$0xff] }
  0xd3   : > { %340 = vst.msk [vmem:[#allocation3 + $0x20] sm:$0xff] %vm327_vm0, %v313_v36  ;;  %432 = vrot.lane.b32.xlu0 %v416_v37, %s1030_s30 }
  0xd4   : > { %v316_v38 = vpop.xlane.xlu1 %315  ;;  %v418_v42 = vld [vmem:[#allocation3 + $0x10] sm:$0xff] }
  0xd5   : > { %341 = vst.msk [vmem:[#allocation3 + $0x28] sm:$0xff] %vm327_vm0, %v316_v38 }
  0xd6   : > { %v319_v39 = vpop.xlane.xlu0 %318  ;;  %v417_v40 = vld [vmem:[#allocation3 + $0x8] sm:$0xff] }
  0xd7   : > { %342 = vst.msk [vmem:[#allocation3 + $0x30] sm:$0xff] %vm327_vm0, %v319_v39  ;;  %434 = vrot.lane.b32.xlu1 %v417_v40, %s1030_s30  ;;  %v506_v39 = vld [vmem:[%s1307_s3] sm:$0xf] }
  0xd8   : > { %v322_v41 = vpop.xlane.xlu1 %321  ;;  %v419_v46 = vld [vmem:[#allocation3 + $0x18] sm:$0xff]  ;;  %825 = vmatpush3.msk.msra.mxu1 %vm599_vm3, %v506_v39  ;;  %v784_v40 = vld [vmem:[%s1306_s2] ss:$0 sm:$0xff] }
  0xd9   : > { %343 = vst.msk [vmem:[#allocation3 + $0x38] sm:$0xff] %vm327_vm0, %v322_v41 }
  0xda   : > { %v420_v43 = vld [vmem:[#allocation3 + $0x20] sm:$0xff]  ;;  %v277_v44 = vpop.xlane.xlu0 %276 }
  0xdb   : > { %436 = vrot.lane.b32.xlu1 %v418_v42, %s1030_s30  ;;  %440 = vrot.lane.b32.xlu0 %v420_v43, %s1030_s30  ;;  %328 = vst.msk [vmem:[#allocation2] sm:$0xff] %vm327_vm0, %v277_v44 }
  0xdc   : > { %v280_v45 = vpop.xlane.xlu1 %279  ;;  %v421_v50 = vld [vmem:[#allocation3 + $0x28] sm:$0xff] }
  0xdd   : > { %329 = vst.msk [vmem:[#allocation2 + $0x8] sm:$0xff] %vm327_vm0, %v280_v45  ;;  %v786_v45 = vld [vmem:[%s1308_s4] ss:$0 sm:$0xff] }
  0xde   : > { %v422_v47 = vld [vmem:[#allocation3 + $0x30] sm:$0xff]  ;;  %v283_v48 = vpop.xlane.xlu0 %282 }
  0xdf   : > { %438 = vrot.lane.b32.xlu1 %v419_v46, %s1030_s30  ;;  %444 = vrot.lane.b32.xlu0 %v422_v47, %s1030_s30  ;;  %330 = vst.msk [vmem:[#allocation2 + $0x10] sm:$0xff] %vm327_vm0, %v283_v48 }
  0xe0   : > { %v286_v49 = vpop.xlane.xlu1 %285  ;;  %v423_v55 = vld [vmem:[#allocation3 + $0x38] sm:$0xff] }
  0xe1   : > { %331 = vst.msk [vmem:[#allocation2 + $0x18] sm:$0xff] %vm327_vm0, %v286_v49 }
  0xe2   : > { %v289_v51 = vpop.xlane.xlu0 %288  ;;  %v400_v6 = vld [vmem:[#allocation2] sm:$0xff] }
  0xe3   : > { %442 = vrot.lane.b32.xlu1 %v421_v50, %s1030_s30  ;;  %332 = vst.msk [vmem:[#allocation2 + $0x20] sm:$0xff] %vm327_vm0, %v289_v51  ;;  %v408_v7 = vmul.f32 0.00390625, %v400_v6 }
  0xe4   : > { %v292_v52 = vpop.xlane.xlu1 %291  ;;  %v401_v9 = vld [vmem:[#allocation2 + $0x8] sm:$0xff] }
  0xe5   : > { %333 = vst.msk [vmem:[#allocation2 + $0x28] sm:$0xff] %vm327_vm0, %v292_v52  ;;  %v409_v11 = vmul.f32 0.00390625, %v401_v9 }
  0xe6   : > { %v295_v61 = vpop.xlane.xlu0 %294  ;;  %v402_v13 = vld [vmem:[#allocation2 + $0x10] sm:$0xff] }
  0xe7   : > { %446 = vrot.lane.b32.xlu1 %v423_v55, %s1030_s30  ;;  %334 = vst.msk [vmem:[#allocation2 + $0x30] sm:$0xff] %vm327_vm0, %v295_v61  ;;  %v410_v15 = vmul.f32 0.00390625, %v402_v13  ;;  %s686_s30 = scalar_lea.sflag [#allocation6], %s1177_s29 }
  0xe8   : > { %v298_v63 = vpop.xlane.xlu1 %297  ;;  %v403_v17 = vld [vmem:[#allocation2 + $0x18] sm:$0xff] }
  0xe9   : > { %335 = vst.msk [vmem:[#allocation2 + $0x38] sm:$0xff] %vm327_vm0, %v298_v63  ;;  %v411_v19 = vmul.f32 0.00390625, %v403_v17 }
  0xea   : > { %v404_v21 = vld [vmem:[#allocation2 + $0x20] sm:$0xff] }
  0xeb   : > { %v412_v24 = vmul.f32 0.00390625, %v404_v21 }
  0xec   : > { %v405_v25 = vld [vmem:[#allocation2 + $0x28] sm:$0xff] }
  0xed   : > { %v413_v28 = vmul.f32 0.00390625, %v405_v25 }
  0xee   : > { %v406_v29 = vld [vmem:[#allocation2 + $0x30] sm:$0xff] }
  0xef   : > { %v414_v32 = vmul.f32 0.00390625, %v406_v29 }
  0xf0   : > { %v407_v33 = vld [vmem:[#allocation2 + $0x38] sm:$0xff] }
  0xf1   : > { %v415_v36 = vmul.f32 0.00390625, %v407_v33 }
 0x145   : > { %v433_v8 = vpop.permute.xlu0 %432 }
 0x146   : > { %v457_v10 = vsel %vm327_vm0, %v408_v7, %v433_v8 }
 0x147   : > { %465 = vxpose.xlu0.b32.start [1/8] (short) (narrow) %v457_v10, 8 }
 0x149   : > { %v435_v12 = vpop.permute.xlu1 %434 }
 0x14a   : > { %v458_v14 = vsel %vm327_vm0, %v409_v11, %v435_v12 }
 0x14b   : > { %466 = vxpose.xlu0.b32.cont [2/8] (short) (narrow) %v458_v14, 8 }
 0x14d   : > { %v437_v16 = vpop.permute.xlu1 %436  ;;  %v441_v23 = vpop.permute.xlu0 %440 }
 0x14e   : > { %v459_v18 = vsel %vm327_vm0, %v410_v15, %v437_v16  ;;  %v461_v26 = vsel %vm327_vm0, %v412_v24, %v441_v23 }
 0x14f   : > { %467 = vxpose.xlu0.b32.cont [3/8] (short) (narrow) %v459_v18, 8 }
 0x151   : > { %v439_v20 = vpop.permute.xlu1 %438  ;;  %v445_v31 = vpop.permute.xlu0 %444 }
 0x152   : > { %v460_v22 = vsel %vm327_vm0, %v411_v19, %v439_v20  ;;  %v463_v34 = vsel %vm327_vm0, %v414_v32, %v445_v31 }
 0x153   : > { %468 = vxpose.xlu0.b32.cont [4/8] (short) (narrow) %v460_v22, 8 }
 0x155   : > { %v443_v27 = vpop.permute.xlu1 %442 }
 0x156   : > { %v462_v30 = vsel %vm327_vm0, %v413_v28, %v443_v27 }
 0x157   : > { %469 = vxpose.xlu0.b32.cont [5/8] (short) (narrow) %v461_v26, 8 }
 0x159   : > { %v447_v35 = vpop.permute.xlu1 %446 }
 0x15a   : > { %v464_v37 = vsel %vm327_vm0, %v415_v36, %v447_v35 }
 0x15b   : > { %470 = vxpose.xlu0.b32.cont [6/8] (short) (narrow) %v462_v30, 8 }
 0x15f   : > { %471 = vxpose.xlu0.b32.cont [7/8] (short) (narrow) %v463_v34, 8 }
 0x163   : > { %472 = vxpose.xlu0.b32.end [8/8] (short) (narrow) %v464_v37, 8 }
 0x1c7   : > { %v481_v38 = vpop.trf.xlu0 }
 0x1c8   : > { %822 = vmatmul.mubr.msk.f32.vlgmr.msra.gmra.mrb[0].mxu0 %vm514_vm2, %v481_v38 }
 0x29b   : > { %v584_v41 = vpop.f32.mrb[0].mxu0 }
 0x29c   : > { %v585_v42 = vadd.f32 %v784_v40, %v584_v41  ;;  %v823_v43 = vpop.f32.mrb[1].mxu0 }
 0x29e   : > { %v588_v44 = vmax.f32 %v585_v42, 0.0 }
 0x2a0   : > { %827 = vmatmul.mubr.msk.f32.vlgmr.msra.gmra.mrb[0].mxu1 %vm595_vm4, %v588_v44 }
 0x373   : > { %v669_v46 = vpop.f32.mrb[0].mxu1 }
 0x374   : > { %v670_v47 = vadd.f32 %v786_v45, %v669_v46  ;;  %v828_v48 = vpop.f32.mrb[1].mxu1 }
 0x376   : > { %v674_v49 = vrot.slane %v670_v47, 1 }
 0x378   : > { %v676_v50 = vadd.f32 %v674_v49, %v670_v47 }
 0x37a   : > { %v789_v51 = vmul.f32 -1.442695, %v676_v50 }
 0x37c   : > { %909 = vpow2.f32 %v789_v51 }
 0x386   : > { %v910_v52 = vpop.eup %909 }
 0x387   : > { %v680_v53 = vadd.f32 1.0, %v910_v52 }
 0x389   : > { %911 = vrcp.f32 %v680_v53 }
 0x393   : > { %v912_v54 = vpop.eup %911 }
 0x394   : > { %684 = vst.msk [vmem:[%s257_s27] sm:$0x1] %vm683_vm5, %v912_v54 }
 0x395   : > { %956 = shalt.err (!%p953_p5)
}
 0x396   : > { %s957_s29 = scalar_lea.hbm %s1255_s14, 16  ;;  %s961_s13 = scalar_lea.hbm %s1309_s5, 32 }
 0x397   : > { %p958_p4 = scmp.ne.s32.totalorder %s1255_s14, %s957_s29  ;;  %p962_p12 = scmp.lt.u32.totalorder %s1255_s14, %s1309_s5 }
 0x398   : > { %p963_p1 = scmp.lt.u32.totalorder %s961_s13, %s957_s29  ;;  %p965_p8 = scmp.lt.u32.totalorder %s957_s29, %s1255_s14 }
 0x399   : > { %p959_p7 = pnand %p958_p4, %p1317_p9 }
 0x39a   : > { %p964_p3 = por %p963_p1, %p962_p12 }
 0x39b   : > { %p960_p10 = pneg %p959_p7 }
 0x39c   : > { %p966_p11 = por %p965_p8, %p964_p3 }
 0x39e   : > { %p967_p0 = pnand %p966_p11, %p960_p10 }
 0x3a0   : > { %970 = shalt.err (!%p967_p0)
}
 0x3a1   : > { %843 = dma.vmem_to_hbm [thread:$0]  (%p1317_p9), %s1257_s28, 16, %s1255_s14, %s686_s30  }
 0x3a2 PF: > { %s710_s27 = sand.u32 1, %s1005_s18   ;;  %p1318_p6 = scmp.ne.s32.totalorder %s1314_s8, 0 }
 0x3a3   : > { %p1319_p13 = scmp.ge.s32.totalorder %s1025_s23, 2  ;;  %s711_s10 = scalar_lea.sflag [#allocation6], %s710_s27 }
 0x3a5   : > { %p850_p2 = pnand %p1319_p13, %p1318_p6 }
 0x3a7   : > { %1000 = dma.done.wait (!%p850_p2), %s711_s10, 16  }
 0x3a8   : > { %1002 = vsyncadd (!%p850_p2), %s711_s10, 4294967280  ;;  %s21_s23 = sadd.s32 1, %s1025_s23   ;;  %s1320_s18 = smov %s1009_s19 }
 0x3a9   : > { %p18_p5 = scmp.ge.s32.totalorder %s21_s23, 4   ;;  %s1321_s19 = smov %s1013_s20 }
 0x3aa   : > { %s1322_s20 = smov %s1121_s7  ;;  %s1323_s21 = smov %s1021_s22 }
 0x3ab   : > { %s1324_s22 = smov %s1326_s26  ;;  %20 = sbr.rel (!%p18_p5) target bundleno = 6 (0x6), region = 97 }
 0x3b2   :  { %715 = vsyncpa [#allocation5], 1 }
 0x3b3   :  { %717 = vsyncpa [#allocation5 + $0x1], 1 }
 0x3b4   :  { %718 = vsyncpa [#allocation6], 1 }
 0x3b5   :  { %720 = vsyncpa [#allocation6 + $0x1], 1 }

</bundles_post_ra>
